<compile_context>
chip_gen: v7x
topology: tpu7x:2x2x1
jax: 0.10.0
libtpu: 0.0.40
codegen_flags: <defaults>
</compile_context>

<pallas_src>
import jax
import jax.numpy as jnp
from jax import lax
from jax.experimental import pallas as pl
from jax.experimental.pallas import tpu as pltpu  # noqa: F401  (kept for TPU-specific tuning hooks)

N, C_IN, C_OUT, L, K, PAD = 4, 128, 128, 20, 3, 1
L_PAD = L + 2 * PAD          # 22: zero-padded length so shifted windows are static slices


def convt_sigmoid_kernel(a_ref, w_ref, b_ref, o_ref):
    # a_ref: (N*L, K*C_IN)   packed im2col slab (built in the wrapper)
    # w_ref: (K*C_IN, C_OUT) W_mat[k*C_IN + ci, co] = W[ci, co, k]
    # b_ref: (1, C_OUT)
    # o_ref: (N*L, C_OUT)    lane-dense output rows (n*L + l)
    acc = jnp.dot(a_ref[...], w_ref[...], preferred_element_type=jnp.float32)  # (N*L, C_OUT)
    o_ref[...] = jax.nn.sigmoid(acc + b_ref[...]).astype(o_ref.dtype)


def convt_sigmoid(x, weight, bias):
    """x: (N, C_IN, L) f32; weight: (C_IN, C_OUT, K) f32 (PyTorch layout); bias: (C_OUT,)."""
    # y[n, co, l] = b[co] + sum_k sum_ci W[ci, co, k] * x[n, ci, l + PAD - k]
    # With x_pad[n, j, ci] = x[n, ci, j - PAD]:  x[n, ci, l + PAD - k] = x_pad[n, l + 2*PAD - k, ci]
    x_t = jnp.transpose(x, (0, 2, 1))                                # (N, L, C_IN), channel-last
    x_p = jnp.pad(x_t, ((0, 0), (PAD, PAD), (0, 0)))                 # (N, L_PAD, C_IN)
    # im2col in the wrapper: a[n, l, k*C_IN + ci] = x_p[n, l + 2*PAD - k, ci]
    windows = [x_p[:, 2 * PAD - k: 2 * PAD - k + L, :] for k in range(K)]
    a_mat = jnp.concatenate(windows, axis=-1).reshape(N * L, K * C_IN)   # (80, 384)
    # Fused-contraction weight matrix: (K*C_IN, C_OUT).
    w_mat = jnp.transpose(weight, (2, 0, 1)).reshape(K * C_IN, C_OUT)    # (384, 128)
    b = bias.reshape(1, C_OUT)

    out_flat = pl.pallas_call(
        convt_sigmoid_kernel,
        out_shape=jax.ShapeDtypeStruct((N * L, C_OUT), x.dtype),
        in_specs=[
            pl.BlockSpec((N * L, K * C_IN), lambda: (0, 0)),
            pl.BlockSpec((K * C_IN, C_OUT), lambda: (0, 0)),
            pl.BlockSpec((1, C_OUT), lambda: (0, 0)),
        ],
        out_specs=pl.BlockSpec((N * L, C_OUT), lambda: (0, 0)),
    )(a_mat, w_mat, b)

    # Back to PyTorch NCL layout: (N*L, C_OUT) -> (N, L, C_OUT) -> (N, C_OUT, L).
    return jnp.transpose(out_flat.reshape(N, L, C_OUT), (0, 2, 1))


def reference(x, weight, bias):
    # ConvTranspose1d(stride=1, padding=PAD) == Conv1d with flipped kernel, padding = K-1-PAD
    w_conv = jnp.transpose(weight, (1, 0, 2))[:, :, ::-1]            # (C_OUT, C_IN, K)
    y = lax.conv_general_dilated(
        x, w_conv, window_strides=(1,), padding=[(K - 1 - PAD, K - 1 - PAD)],
        dimension_numbers=("NCH", "OIH", "NCH"))
    return jax.nn.sigmoid(y + bias.reshape(1, C_OUT, 1))


if __name__ == "__main__":
    key = jax.random.PRNGKey(0)
    kx, kw, kb = jax.random.split(key, 3)
    x1 = jax.random.normal(kx, (N, C_IN, L), dtype=jnp.float32)
    # Deterministic ConvTranspose1d params (PyTorch weight layout: (in_ch, out_ch, K))
    bound = 1.0 / (C_IN * K) ** 0.5
    weight = jax.random.uniform(kw, (C_IN, C_OUT, K), jnp.float32, -bound, bound)
    bias = jax.random.uniform(kb, (C_OUT,), jnp.float32, -bound, bound)

    out = convt_sigmoid(x1, weight, bias)
    jax.block_until_ready(out)

    ref = reference(x1, weight, bias)
    assert out.shape == (N, C_OUT, L)
    assert jnp.allclose(out, ref, atol=1e-5, rtol=1e-5)
    print("KERNEL_OK")
</pallas_src>

<mosaic_0001>
module attributes {stable_mosaic.version = 11 : i64} {
  func.func @convt_sigmoid_kernel(%arg0: memref<80x384xf32, #tpu.memory_space<vmem>>, %arg1: memref<384x128xf32, #tpu.memory_space<vmem>>, %arg2: memref<1x128xf32, #tpu.memory_space<vmem>>, %arg3: memref<80x128xf32, #tpu.memory_space<vmem>>) attributes {dimension_semantics = [], scalar_prefetch = 0 : i64, scratch_operands = 0 : i64, tpu.core_type = #tpu.core_type<tc>} {
    %c0 = arith.constant 0 : index
    %c0_0 = arith.constant 0 : index
    %0 = vector.load %arg0[%c0, %c0_0] : memref<80x384xf32, #tpu.memory_space<vmem>>, vector<80x384xf32>
    %c0_1 = arith.constant 0 : index
    %c0_2 = arith.constant 0 : index
    %1 = vector.load %arg1[%c0_1, %c0_2] : memref<384x128xf32, #tpu.memory_space<vmem>>, vector<384x128xf32>
    %cst = arith.constant dense<0.000000e+00> : vector<80x128xf32>
    %2 = tpu.matmul %0, %1, %cst {dimension_numbers = #tpu.dot_dimension_numbers<[1], [0], [0], [1], [0, 0, 1, 1], [], []>} : vector<80x384xf32>, vector<384x128xf32>, vector<80x128xf32> -> vector<80x128xf32>
    %c0_3 = arith.constant 0 : index
    %c0_4 = arith.constant 0 : index
    %3 = vector.load %arg2[%c0_3, %c0_4] : memref<1x128xf32, #tpu.memory_space<vmem>>, vector<1x128xf32>
    %4 = vector.broadcast %3 : vector<1x128xf32> to vector<80x128xf32>
    %5 = arith.addf %2, %4 : vector<80x128xf32>
    %6 = arith.negf %5 : vector<80x128xf32>
    %7 = math.exp %6 : vector<80x128xf32>
    %cst_5 = arith.constant 1.000000e+00 : f32
    %8 = vector.broadcast %cst_5 : f32 to vector<80x128xf32>
    %9 = arith.addf %8, %7 : vector<80x128xf32>
    %10 = arith.divf %8, %9 : vector<80x128xf32>
    %c0_6 = arith.constant 0 : index
    %c0_7 = arith.constant 0 : index
    %11 = vector.load %arg3[%c0_6, %c0_7] : memref<80x128xf32, #tpu.memory_space<vmem>>, vector<80x128xf32>
    tpu.vector_store %arg3[%c0_6, %c0_7], %10 {strides = array<i32>} : memref<80x128xf32, #tpu.memory_space<vmem>>, vector<80x128xf32>,
    return
  }
}

</mosaic_0001>

<bundles_post_ra>
// kernel: tpu_custom_call.1
= control target key start
LH: loop header
LB: loop body
LE: loop exit
PB: predicated region body
PF: predicated region fallthrough
CT: control target
= control target key end

     0   :  { %8 = vsyncpa [#allocation3], 0  ;;  %s859_s0 = inlined_call_operand.hbm [shape: f32[80,384], index: 0, kind: input, shape index: {}]   ;;  %s860_s1 = inlined_call_operand.hbm [shape: f32[384,128], index: 1, kind: input, shape index: {}]   ;;  %s861_s2 = inlined_call_operand.vmem [shape: f32[1,128], index: 2, kind: input, shape index: {}]   ;;  %s862_s3 = inlined_call_operand.hbm [shape: f32[80,128], index: 3, kind: output, shape index: {}]  }
   0x1   :  { %9 = vsyncpa [#allocation6], 0 }
   0x2   :  { %10 = vsyncpa [#allocation4], 0  ;;  %s775_s12 = smov [#allocation2]   ;;  %s703_s16 = scalar_lea.hbm %s859_s0, 3840 }
   0x3   :  { %s16_s13 = sshll.u32 %s775_s12, 4  ;;  %p704_p0 = scmp.ne.s32.totalorder %s859_s0, %s703_s16  ;;  %s17_s13 = int_to_ptr.vmem [resolvable:$true] %s16_s13 }
   0x4   :  { %p707_p1 = scmp.lt.u32.totalorder %s703_s16, %s859_s0 }
   0x6   :  { %p709_p2 = pnand %p707_p1, %p704_p0 }
   0x8   :  { %712 = shalt.err (!%p709_p2)
}
   0x9   :  { %s713_s21 = scalar_lea.vmem %s17_s13, 3840  ;;  %p718_p4 = scmp.lt.s32.totalorder %s17_s13, %s17_s13 }
   0xa   :  { %p714_p3 = scmp.ne.s32.totalorder %s17_s13, %s713_s21  ;;  %p719_p5 = scmp.lt.s32.totalorder %s713_s21, %s713_s21 }
   0xc   :  { %p720_p6 = por %p719_p5, %p718_p4 }
   0xe   :  { %p721_p7 = pnand %p720_p6, %p714_p3 }
  0x10   :  { %724 = shalt.err (!%p721_p7)
}
  0x11   :  { %s776_s22 = smov 384   ;;  %s777_s23 = smov 24  }
  0x12   :  { %22 = dma.hbm_to_vmem [thread:$0]  %s859_s0, 3840, %s17_s13, [#allocation3], %s776_s22, %s776_s22, %s777_s23  }
  0x13   :  { %s778_s26 = smov [#allocation5]   ;;  %s725_s30 = scalar_lea.hbm %s860_s1, 6144 }
  0x14   :  { %s28_s27 = sshll.u32 %s778_s26, 4  ;;  %p726_p8 = scmp.ne.s32.totalorder %s860_s1, %s725_s30  ;;  %s29_s27 = int_to_ptr.vmem [resolvable:$true] %s28_s27 }
  0x15   :  { %p729_p9 = scmp.lt.u32.totalorder %s725_s30, %s860_s1 }
  0x17   :  { %p731_p10 = pnand %p729_p9, %p726_p8 }
  0x19   :  { %734 = shalt.err (!%p731_p10)
}
  0x1a   :  { %s735_s8 = scalar_lea.vmem %s29_s27, 6144  ;;  %p740_p12 = scmp.lt.s32.totalorder %s29_s27, %s29_s27 }
  0x1b   :  { %p736_p11 = scmp.ne.s32.totalorder %s29_s27, %s735_s8  ;;  %p741_p13 = scmp.lt.s32.totalorder %s735_s8, %s735_s8 }
  0x1d   :  { %p742_p0 = por %p741_p13, %p740_p12 }
  0x1f   :  { %p743_p1 = pnand %p742_p0, %p736_p11 }
  0x21   :  { %746 = shalt.err (!%p743_p1)
}
  0x22   :  { %s779_s0 = smov 128   ;;  %s780_s9 = smov 8  }
  0x23   :  { %34 = dma.hbm_to_vmem [thread:$0]  %s860_s1, 6144, %s29_s27, [#allocation6], %s779_s0, %s779_s0, %s780_s9  }
  0x24   :  { %769 = dma.done.wait [#allocation3], 3840  }
  0x25   :  { %770 = vsyncadd [#allocation3], 4294963456 }
  0x26   :  { %771 = dma.done.wait [#allocation6], 6144  }
  0x27   :  { %772 = vsyncadd [#allocation6], 4294961152  ;;  %v89_v0 = vld [vmem:[#allocation5 + $0x80] sm:$0xff]  ;;  %v90_v1 = vld [vmem:[#allocation5 + $0x88] sm:$0xff] }
  0x28   :  { %v73_v2 = vld [vmem:[#allocation5] sm:$0xff]  ;;  %v592_v3 = vpack.c.bf16 %v90_v1, %v89_v0  ;;  %v74_v4 = vld [vmem:[#allocation5 + $0x8] sm:$0xff]  ;;  %v91_v5 = vld [vmem:[#allocation5 + $0x90] sm:$0xff] }
  0x29   :  { %v92_v6 = vld [vmem:[#allocation5 + $0x98] sm:$0xff]  ;;  %v594_v7 = vpack.c.bf16 %v74_v4, %v73_v2  ;;  %v105_v9 = vld [vmem:[#allocation5 + $0x100] sm:$0xff]  ;;  %v106_v10 = vld [vmem:[#allocation5 + $0x108] sm:$0xff] }
  0x2a   :  { %v596_v8 = vpack.c.bf16 %v92_v6, %v91_v5  ;;  %v75_v11 = vld [vmem:[#allocation5 + $0x10] sm:$0xff]  ;;  %593 = vmatprep.subr.bf16.mxu0 %v592_v3  ;;  %v624_v12 = vpack.c.bf16 %v106_v10, %v105_v9  ;;  %v76_v13 = vld [vmem:[#allocation5 + $0x18] sm:$0xff]  ;;  %v93_v14 = vld [vmem:[#allocation5 + $0xa0] sm:$0xff] }
  0x2b   :  { %v94_v15 = vld [vmem:[#allocation5 + $0xa8] sm:$0xff]  ;;  %595 = vmatpush3.bf16.msra.mxu0 %v594_v7  ;;  %v598_v16 = vpack.c.bf16 %v76_v13, %v75_v11  ;;  %v107_v17 = vld [vmem:[#allocation5 + $0x110] sm:$0xff]  ;;  %v108_v18 = vld [vmem:[#allocation5 + $0x118] sm:$0xff] }
  0x2c   :  { %597 = vmatprep.subr.bf16.mxu0 %v596_v8  ;;  %625 = vmatprep.subr.bf16.mxu1 %v624_v12  ;;  %v600_v19 = vpack.c.bf16 %v94_v15, %v93_v14  ;;  %v628_v20 = vpack.c.bf16 %v108_v18, %v107_v17  ;;  %v77_v21 = vld [vmem:[#allocation5 + $0x20] sm:$0xff]  ;;  %v78_v22 = vld [vmem:[#allocation5 + $0x28] sm:$0xff]  ;;  %v95_v23 = vld [vmem:[#allocation5 + $0xb0] sm:$0xff] }
  0x2d   :  { %627 = vmatpush3.bf16.msra.mxu1 %v624_v12  ;;  %v96_v24 = vld [vmem:[#allocation5 + $0xb8] sm:$0xff]  ;;  %v109_v25 = vld [vmem:[#allocation5 + $0x120] sm:$0xff]  ;;  %v110_v26 = vld [vmem:[#allocation5 + $0x128] sm:$0xff]  ;;  %v602_v28 = vpack.c.bf16 %v78_v22, %v77_v21 }
  0x2e   :  { %629 = vmatprep.subr.bf16.mxu1 %v628_v20  ;;  %v632_v27 = vpack.c.bf16 %v110_v26, %v109_v25  ;;  %v111_v29 = vld [vmem:[#allocation5 + $0x130] sm:$0xff]  ;;  %v112_v30 = vld [vmem:[#allocation5 + $0x138] sm:$0xff]  ;;  %v604_v31 = vpack.c.bf16 %v96_v24, %v95_v23  ;;  %v97_v34 = vld [vmem:[#allocation5 + $0xc0] sm:$0xff] }
  0x2f   :  { %599 = vmatpush3.bf16.msra.mxu0 %v598_v16  ;;  %v79_v32 = vld [vmem:[#allocation5 + $0x30] sm:$0xff]  ;;  %v80_v33 = vld [vmem:[#allocation5 + $0x38] sm:$0xff]  ;;  %v98_v35 = vld [vmem:[#allocation5 + $0xc8] sm:$0xff]  ;;  %v636_v36 = vpack.c.bf16 %v112_v30, %v111_v29 }
  0x30   :  { %601 = vmatprep.subr.bf16.mxu0 %v600_v19  ;;  %v606_v37 = vpack.c.bf16 %v80_v33, %v79_v32  ;;  %v113_v38 = vld [vmem:[#allocation5 + $0x140] sm:$0xff]  ;;  %v114_v39 = vld [vmem:[#allocation5 + $0x148] sm:$0xff]  ;;  %v608_v40 = vpack.c.bf16 %v98_v35, %v97_v34  ;;  %v99_v43 = vld [vmem:[#allocation5 + $0xd0] sm:$0xff] }
  0x31   :  { %631 = vmatpush3.bf16.msra.mxu1 %v628_v20  ;;  %v81_v41 = vld [vmem:[#allocation5 + $0x40] sm:$0xff]  ;;  %v82_v42 = vld [vmem:[#allocation5 + $0x48] sm:$0xff]  ;;  %v100_v44 = vld [vmem:[#allocation5 + $0xd8] sm:$0xff]  ;;  %v640_v45 = vpack.c.bf16 %v114_v39, %v113_v38 }
  0x32   :  { %633 = vmatprep.subr.bf16.mxu1 %v632_v27  ;;  %v44_v46 = vld [vmem:[#allocation2 + $0x8] sm:$0xff]  ;;  %v610_v47 = vpack.c.bf16 %v82_v42, %v81_v41  ;;  %v115_v48 = vld [vmem:[#allocation5 + $0x150] sm:$0xff]  ;;  %v612_v50 = vpack.c.bf16 %v100_v44, %v99_v43  ;;  %v45_v53 = vld [vmem:[#allocation2 + $0x10] sm:$0xff] }
  0x33   :  { %603 = vmatpush3.bf16.msra.mxu0 %v602_v28  ;;  %v116_v49 = vld [vmem:[#allocation5 + $0x158] sm:$0xff]  ;;  %192 = vmatprep.mubr.f32.mxu0 %v44_v46  ;;  %v83_v51 = vld [vmem:[#allocation5 + $0x50] sm:$0xff]  ;;  %v101_v54 = vld [vmem:[#allocation5 + $0xe0] sm:$0xff] }
  0x34   :  { %605 = vmatprep.subr.bf16.mxu0 %v604_v31  ;;  %v84_v52 = vld [vmem:[#allocation5 + $0x58] sm:$0xff]  ;;  %v102_v55 = vld [vmem:[#allocation5 + $0xe8] sm:$0xff]  ;;  %577 = vmatprep.mubr.f32.mxu1 %v45_v53  ;;  %v644_v56 = vpack.c.bf16 %v116_v49, %v115_v48  ;;  %v117_v58 = vld [vmem:[#allocation5 + $0x160] sm:$0xff] }
  0x35   :  { %635 = vmatpush3.bf16.msra.mxu1 %v632_v27  ;;  %v614_v57 = vpack.c.bf16 %v84_v52, %v83_v51  ;;  %v118_v59 = vld [vmem:[#allocation5 + $0x168] sm:$0xff]  ;;  %v616_v60 = vpack.c.bf16 %v102_v55, %v101_v54  ;;  %v85_v61 = vld [vmem:[#allocation5 + $0x60] sm:$0xff]  ;;  %v103_v63 = vld [vmem:[#allocation5 + $0xf0] sm:$0xff] }
  0x36   :  { %637 = vmatprep.subr.bf16.mxu1 %v636_v36  ;;  %v86_v62 = vld [vmem:[#allocation5 + $0x68] sm:$0xff]  ;;  %v104_v0 = vld [vmem:[#allocation5 + $0xf8] sm:$0xff]  ;;  %v648_v1 = vpack.c.bf16 %v118_v59, %v117_v58  ;;  %v119_v3 = vld [vmem:[#allocation5 + $0x170] sm:$0xff] }
  0x37   :  { %607 = vmatpush3.bf16.msra.mxu0 %v606_v37  ;;  %v618_v2 = vpack.c.bf16 %v86_v62, %v85_v61  ;;  %v120_v4 = vld [vmem:[#allocation5 + $0x178] sm:$0xff]  ;;  %v620_v5 = vpack.c.bf16 %v104_v0, %v103_v63  ;;  %v87_v6 = vld [vmem:[#allocation5 + $0x70] sm:$0xff]  ;;  %v46_v14 = vld [vmem:[#allocation2 + $0x18] sm:$0xff] }
  0x38   :  { %609 = vmatprep.subr.bf16.mxu0 %v608_v40  ;;  %v88_v7 = vld [vmem:[#allocation5 + $0x78] sm:$0xff]  ;;  %v652_v8 = vpack.c.bf16 %v120_v4, %v119_v3  ;;  %v43_v10 = vld [vmem:[#allocation2] sm:$0xff]  ;;  %v50_v15 = vld [vmem:[#allocation2 + $0x38] sm:$0xff] }
  0x39   :  { %639 = vmatpush3.bf16.msra.mxu1 %v636_v36  ;;  %v622_v9 = vpack.c.bf16 %v88_v7, %v87_v6  ;;  %v47_v11 = vld [vmem:[#allocation2 + $0x20] sm:$0xff]  ;;  %v48_v12 = vld [vmem:[#allocation2 + $0x28] sm:$0xff]  ;;  %v54_v16 = vld [vmem:[#allocation2 + $0x58] sm:$0xff] }
  0x3a   :  { %641 = vmatprep.subr.bf16.mxu1 %v640_v45  ;;  %v51_v13 = vld [vmem:[#allocation2 + $0x40] sm:$0xff]  ;;  %v57_v17 = vld [vmem:[#allocation2 + $0x70] sm:$0xff]  ;;  %v60_v20 = vld [vmem:[#allocation2 + $0x88] sm:$0xff] }
  0x3b   :  { %611 = vmatpush3.bf16.msra.mxu0 %v610_v47  ;;  %v49_v18 = vld [vmem:[#allocation2 + $0x30] sm:$0xff]  ;;  %v63_v21 = vld [vmem:[#allocation2 + $0xa0] sm:$0xff]  ;;  %v52_v22 = vld [vmem:[#allocation2 + $0x48] sm:$0xff] }
  0x3c   :  { %613 = vmatprep.subr.bf16.mxu0 %v612_v50  ;;  %v53_v19 = vld [vmem:[#allocation2 + $0x50] sm:$0xff]  ;;  %v56_v23 = vld [vmem:[#allocation2 + $0x68] sm:$0xff]  ;;  %v66_v24 = vld [vmem:[#allocation2 + $0xb8] sm:$0xff] }
  0x3d   :  { %643 = vmatpush3.bf16.msra.mxu1 %v640_v45  ;;  %v69_v25 = vld [vmem:[#allocation2 + $0xd0] sm:$0xff]  ;;  %v55_v26 = vld [vmem:[#allocation2 + $0x60] sm:$0xff]  ;;  %v72_v28 = vld [vmem:[#allocation2 + $0xe8] sm:$0xff] }
  0x3e   :  { %645 = vmatprep.subr.bf16.mxu1 %v644_v56  ;;  %v59_v27 = vld [vmem:[#allocation2 + $0x80] sm:$0xff]  ;;  %v58_v29 = vld [vmem:[#allocation2 + $0x78] sm:$0xff]  ;;  %v61_v31 = vld [vmem:[#allocation2 + $0x90] sm:$0xff] }
  0x3f   :  { %615 = vmatpush3.bf16.msra.mxu0 %v614_v57  ;;  %v62_v30 = vld [vmem:[#allocation2 + $0x98] sm:$0xff]  ;;  %v65_v32 = vld [vmem:[#allocation2 + $0xb0] sm:$0xff]  ;;  %v64_v33 = vld [vmem:[#allocation2 + $0xa8] sm:$0xff] }
  0x40   :  { %617 = vmatprep.subr.bf16.mxu0 %v616_v60  ;;  %v68_v34 = vld [vmem:[#allocation2 + $0xc8] sm:$0xff]  ;;  %v67_v35 = vld [vmem:[#allocation2 + $0xc0] sm:$0xff]  ;;  %v70_v37 = vld [vmem:[#allocation2 + $0xd8] sm:$0xff] }
  0x41   :  { %647 = vmatpush3.bf16.msra.mxu1 %v644_v56  ;;  %v71_v36 = vld [vmem:[#allocation2 + $0xe0] sm:$0xff] }
  0x42   :  { %649 = vmatprep.subr.bf16.mxu1 %v648_v1  ;;  %v832_v40 = vld [vmem:[%s861_s2] ss:$0 sm:$0xff]  ;;  %s781_s2 = smov [#allocation7]  }
  0x43   :  { %619 = vmatpush3.bf16.msra.mxu0 %v618_v2  ;;  %s433_s13 = sshll.u32 %s781_s2, 4  ;;  %s434_s13 = int_to_ptr.vmem [resolvable:$true] %s433_s13 }
  0x44   :  { %621 = vmatprep.subr.bf16.mxu0 %v620_v5  ;;  %s747_s14 = scalar_lea.vmem %s434_s13, 1280  ;;  %p752_p3 = scmp.lt.s32.totalorder %s434_s13, %s434_s13 }
  0x45   :  { %651 = vmatpush3.bf16.msra.mxu1 %v648_v1  ;;  %p748_p2 = scmp.ne.s32.totalorder %s434_s13, %s747_s14  ;;  %p753_p4 = scmp.lt.s32.totalorder %s747_s14, %s747_s14 }
  0x46   :  { %653 = vmatprep.subr.bf16.mxu1 %v652_v8 }
  0x47   :  { %623 = vmatpush3.bf16.msra.mxu0 %v622_v9  ;;  %p754_p5 = por %p753_p4, %p752_p3 }
  0x49   :  { %655 = vmatpush3.bf16.msra.mxu1 %v652_v8  ;;  %p755_p6 = pnand %p754_p5, %p748_p2 }
  0x4a   :  { %193 = vmatmul.mubr.f32.vlgmr.msra.gmra.mrb[0].mxu0 %v43_v10 }
  0x4b   :  { %197 = vmatprep.mubr.f32.mxu0 %v47_v11 }
  0x4c   :  { %578 = vmatmul.mubr.f32.vlgmr.msra.gmra.mrb[0].mxu1 %v48_v12 }
  0x4d   :  { %580 = vmatprep.mubr.f32.mxu1 %v51_v13 }
  0x4e   :  { %198 = vmatmul.mubr.f32.gmra.mrb[2].mxu0 %v46_v14 }
  0x4f   :  { %202 = vmatprep.mubr.f32.mxu0 %v50_v15 }
  0x50   :  { %581 = vmatmul.mubr.f32.gmra.mrb[2].mxu1 %v54_v16 }
  0x51   :  { %583 = vmatprep.mubr.f32.mxu1 %v57_v17 }
  0x52   :  { %203 = vmatmul.mubr.f32.gmra.mrb[4].mxu0 %v49_v18 }
  0x53   :  { %207 = vmatprep.mubr.f32.mxu0 %v53_v19 }
  0x54   :  { %584 = vmatmul.mubr.f32.gmra.mrb[4].mxu1 %v60_v20 }
  0x55   :  { %586 = vmatprep.mubr.f32.mxu1 %v63_v21 }
  0x56   :  { %208 = vmatmul.mubr.f32.gmra.mrb[6].mxu0 %v52_v22 }
  0x57   :  { %212 = vmatprep.mubr.f32.mxu0 %v56_v23 }
  0x58   :  { %587 = vmatmul.mubr.f32.gmra.mrb[6].mxu1 %v66_v24 }
  0x59   :  { %589 = vmatprep.mubr.f32.mxu1 %v69_v25 }
  0x5a   :  { %213 = vmatmul.mubr.f32.gmra.mrb[8].mxu0 %v55_v26 }
  0x5b   :  { %217 = vmatprep.mubr.f32.mxu0 %v59_v27 }
  0x5c   :  { %590 = vmatmul.mubr.f32.gmra.mrb[8].mxu1 %v72_v28 }
  0x5e   :  { %218 = vmatmul.mubr.f32.gmra.mrb[10].mxu0 %v58_v29 }
  0x5f   :  { %222 = vmatprep.mubr.f32.mxu0 %v62_v30 }
  0x62   :  { %223 = vmatmul.mubr.f32.gmra.mrb[12].mxu0 %v61_v31 }
  0x63   :  { %227 = vmatprep.mubr.f32.mxu0 %v65_v32 }
  0x66   :  { %228 = vmatmul.mubr.f32.gmra.mrb[14].mxu0 %v64_v33 }
  0x67   :  { %232 = vmatprep.mubr.f32.mxu0 %v68_v34 }
  0x6a   :  { %233 = vmatmul.mubr.f32.gmra.mrb[16].mxu0 %v67_v35 }
  0x6b   :  { %237 = vmatprep.mubr.f32.mxu0 %v71_v36 }
  0x6e   :  { %238 = vmatmul.mubr.f32.gmra.mrb[18].mxu0 %v70_v37 }
 0x11d   :  { %v489_v38 = vpop.f32.mrb[0].mxu0 }
 0x11e   :  { %v490_v39 = vpop.f32.mrb[1].mxu0 }
 0x11f   :  { %v491_v41 = vadd.f32 %v490_v39, %v489_v38  ;;  %v579_v42 = vpop.f32.mrb[0].mxu1 }
 0x120   :  { %v309_v43 = vpop.f32.mrb[1].mxu1 }
 0x121   :  { %v492_v44 = vpop.f32.mrb[2].mxu0  ;;  %v195_v45 = vadd.f32 %v491_v41, %v832_v40 }
 0x122   :  { %v493_v46 = vpop.f32.mrb[3].mxu0 }
 0x123   :  { %v494_v47 = vadd.f32 %v493_v46, %v492_v44  ;;  %v310_v48 = vadd.f32 %v309_v43, %v195_v45  ;;  %v582_v49 = vpop.f32.mrb[2].mxu1 }
 0x124   :  { %v319_v50 = vpop.f32.mrb[3].mxu1 }
 0x125   :  { %v200_v51 = vadd.f32 %v494_v47, %v832_v40  ;;  %v447_v52 = vmul.f32 -1.442695, %v310_v48  ;;  %v495_v53 = vpop.f32.mrb[4].mxu0 }
 0x126   :  { %v496_v54 = vpop.f32.mrb[5].mxu0 }
 0x127   :  { %v315_v55 = vadd.f32 %v579_v42, %v200_v51  ;;  %663 = vpow2.f32 %v447_v52  ;;  %v497_v56 = vadd.f32 %v496_v54, %v495_v53  ;;  %v585_v57 = vpop.f32.mrb[4].mxu1 }
 0x128   :  { %v329_v58 = vpop.f32.mrb[5].mxu1 }
 0x129   :  { %v448_v59 = vmul.f32 -1.442695, %v315_v55  ;;  %v498_v60 = vpop.f32.mrb[6].mxu0  ;;  %v205_v61 = vadd.f32 %v497_v56, %v832_v40 }
 0x12a   :  { %v499_v62 = vpop.f32.mrb[7].mxu0 }
 0x12b   :  { %665 = vpow2.f32 %v448_v59  ;;  %v500_v63 = vadd.f32 %v499_v62, %v498_v60  ;;  %v320_v0 = vadd.f32 %v319_v50, %v205_v61  ;;  %v588_v1 = vpop.f32.mrb[6].mxu1 }
 0x12c   :  { %v339_v2 = vpop.f32.mrb[7].mxu1 }
 0x12d   :  { %v210_v3 = vadd.f32 %v500_v63, %v832_v40  ;;  %v449_v4 = vmul.f32 -1.442695, %v320_v0  ;;  %v501_v5 = vpop.f32.mrb[8].mxu0 }
 0x12e   :  { %v502_v6 = vpop.f32.mrb[9].mxu0 }
 0x12f   :  { %v325_v7 = vadd.f32 %v582_v49, %v210_v3  ;;  %667 = vpow2.f32 %v449_v4  ;;  %v503_v8 = vadd.f32 %v502_v6, %v501_v5  ;;  %v591_v9 = vpop.f32.mrb[8].mxu1 }
 0x130   :  { %v349_v10 = vpop.f32.mrb[9].mxu1 }
 0x131   :  { %v664_v11 = vpop.eup %663  ;;  %v450_v12 = vmul.f32 -1.442695, %v325_v7  ;;  %v504_v13 = vpop.f32.mrb[10].mxu0  ;;  %v215_v14 = vadd.f32 %v503_v8, %v832_v40 }
 0x132   :  { %v388_v15 = vadd.f32 1.0, %v664_v11  ;;  %v505_v16 = vpop.f32.mrb[11].mxu0 }
 0x133   :  { %669 = vpow2.f32 %v450_v12  ;;  %v506_v17 = vadd.f32 %v505_v16, %v504_v13  ;;  %v330_v18 = vadd.f32 %v329_v58, %v215_v14 }
 0x134   :  { %671 = vrcp.f32 %v388_v15 }
 0x135   :  { %v666_v19 = vpop.eup %665  ;;  %v220_v20 = vadd.f32 %v506_v17, %v832_v40  ;;  %v451_v21 = vmul.f32 -1.442695, %v330_v18  ;;  %v507_v22 = vpop.f32.mrb[12].mxu0 }
 0x136   :  { %v389_v23 = vadd.f32 1.0, %v666_v19  ;;  %v508_v24 = vpop.f32.mrb[13].mxu0 }
 0x137   :  { %v335_v25 = vadd.f32 %v585_v57, %v220_v20  ;;  %673 = vpow2.f32 %v451_v21  ;;  %v509_v26 = vadd.f32 %v508_v24, %v507_v22 }
 0x138   :  { %675 = vrcp.f32 %v389_v23 }
 0x139   :  { %v668_v27 = vpop.eup %667  ;;  %v452_v28 = vmul.f32 -1.442695, %v335_v25  ;;  %v510_v29 = vpop.f32.mrb[14].mxu0  ;;  %v225_v30 = vadd.f32 %v509_v26, %v832_v40 }
 0x13a   :  { %v390_v31 = vadd.f32 1.0, %v668_v27  ;;  %v511_v32 = vpop.f32.mrb[15].mxu0 }
 0x13b   :  { %677 = vpow2.f32 %v452_v28  ;;  %v512_v33 = vadd.f32 %v511_v32, %v510_v29  ;;  %v340_v34 = vadd.f32 %v339_v2, %v225_v30 }
 0x13c   :  { %679 = vrcp.f32 %v390_v31 }
 0x13d   :  { %v670_v35 = vpop.eup %669  ;;  %v230_v36 = vadd.f32 %v512_v33, %v832_v40  ;;  %v453_v37 = vmul.f32 -1.442695, %v340_v34  ;;  %v513_v38 = vpop.f32.mrb[16].mxu0 }
 0x13e   :  { %v672_v39 = vpop.eup %671  ;;  %v391_v41 = vadd.f32 1.0, %v670_v35  ;;  %v514_v42 = vpop.f32.mrb[17].mxu0 }
 0x13f   :  { %418 = vst [vmem:[#allocation7] sm:$0xff] %v672_v39  ;;  %v345_v43 = vadd.f32 %v588_v1, %v230_v36  ;;  %681 = vpow2.f32 %v453_v37  ;;  %v515_v44 = vadd.f32 %v514_v42, %v513_v38 }
 0x140   :  { %683 = vrcp.f32 %v391_v41 }
 0x141   :  { %v674_v45 = vpop.eup %673  ;;  %v454_v46 = vmul.f32 -1.442695, %v345_v43  ;;  %v516_v47 = vpop.f32.mrb[18].mxu0  ;;  %v235_v48 = vadd.f32 %v515_v44, %v832_v40 }
 0x142   :  { %v676_v49 = vpop.eup %675  ;;  %v392_v50 = vadd.f32 1.0, %v674_v45  ;;  %v517_v51 = vpop.f32.mrb[19].mxu0 }
 0x143   :  { %419 = vst [vmem:[#allocation7 + $0x8] sm:$0xff] %v676_v49  ;;  %685 = vpow2.f32 %v454_v46  ;;  %v518_v52 = vadd.f32 %v517_v51, %v516_v47  ;;  %v350_v53 = vadd.f32 %v349_v10, %v235_v48 }
 0x144   :  { %687 = vrcp.f32 %v392_v50 }
 0x145   :  { %v678_v54 = vpop.eup %677  ;;  %v240_v55 = vadd.f32 %v518_v52, %v832_v40  ;;  %v455_v56 = vmul.f32 -1.442695, %v350_v53 }
 0x146   :  { %v680_v57 = vpop.eup %679  ;;  %v393_v58 = vadd.f32 1.0, %v678_v54 }
 0x147   :  { %420 = vst [vmem:[#allocation7 + $0x10] sm:$0xff] %v680_v57  ;;  %v355_v59 = vadd.f32 %v591_v9, %v240_v55  ;;  %689 = vpow2.f32 %v455_v56 }
 0x148   :  { %691 = vrcp.f32 %v393_v58 }
 0x149   :  { %v682_v60 = vpop.eup %681  ;;  %v456_v61 = vmul.f32 -1.442695, %v355_v59 }
 0x14a   :  { %v684_v62 = vpop.eup %683  ;;  %v394_v63 = vadd.f32 1.0, %v682_v60 }
 0x14b   :  { %421 = vst [vmem:[#allocation7 + $0x18] sm:$0xff] %v684_v62  ;;  %693 = vpow2.f32 %v456_v61 }
 0x14c   :  { %695 = vrcp.f32 %v394_v63 }
 0x14d   :  { %v686_v0 = vpop.eup %685 }
 0x14e   :  { %v688_v1 = vpop.eup %687  ;;  %v395_v2 = vadd.f32 1.0, %v686_v0 }
 0x14f   :  { %422 = vst [vmem:[#allocation7 + $0x20] sm:$0xff] %v688_v1 }
 0x150   :  { %697 = vrcp.f32 %v395_v2 }
 0x151   :  { %v690_v40 = vpop.eup %689 }
 0x152   :  { %v692_v3 = vpop.eup %691  ;;  %v396_v4 = vadd.f32 1.0, %v690_v40 }
 0x153   :  { %423 = vst [vmem:[#allocation7 + $0x28] sm:$0xff] %v692_v3 }
 0x154   :  { %699 = vrcp.f32 %v396_v4 }
 0x155   :  { %v694_v5 = vpop.eup %693 }
 0x156   :  { %v696_v6 = vpop.eup %695  ;;  %v397_v7 = vadd.f32 1.0, %v694_v5 }
 0x157   :  { %424 = vst [vmem:[#allocation7 + $0x30] sm:$0xff] %v696_v6 }
 0x158   :  { %701 = vrcp.f32 %v397_v7 }
 0x15a   :  { %v698_v8 = vpop.eup %697 }
 0x15b   :  { %425 = vst [vmem:[#allocation7 + $0x38] sm:$0xff] %v698_v8 }
 0x15e   :  { %v700_v9 = vpop.eup %699 }
 0x15f   :  { %426 = vst [vmem:[#allocation7 + $0x40] sm:$0xff] %v700_v9 }
 0x162   :  { %v702_v10 = vpop.eup %701 }
 0x163   :  { %427 = vst [vmem:[#allocation7 + $0x48] sm:$0xff] %v702_v10 }
 0x164   :  { %758 = shalt.err (!%p755_p6)
}
 0x165   :  { %s759_s17 = scalar_lea.hbm %s862_s3, 1280 }
 0x166   :  { %p760_p7 = scmp.ne.s32.totalorder %s862_s3, %s759_s17  ;;  %p763_p8 = scmp.lt.u32.totalorder %s759_s17, %s862_s3 }
 0x168   :  { %p765_p9 = pnand %p763_p8, %p760_p7 }
 0x16a   :  { %768 = shalt.err (!%p765_p9)
}
 0x16b   :  { %439 = dma.vmem_to_hbm [thread:$0]  %s434_s13, 1280, %s862_s3, [#allocation4], %s779_s0, %s779_s0, %s780_s9  }
 0x16c   :  { %773 = dma.done.wait [#allocation4], 1280  }
 0x16d   :  { %774 = vsyncadd [#allocation4], 4294966016 }
 0x16e   :  { %443 = vsyncpa [#allocation3], 1 }
 0x16f   :  { %444 = vsyncpa [#allocation6], 1 }
 0x170   :  { %445 = vsyncpa [#allocation4], 1 }

</bundles_post_ra>
